<compile_context>
chip_gen: v5e
topology: v5e:2x2
jax: 0.10.0
libtpu: 0.0.40
codegen_flags: <defaults>
</compile_context>

<pallas_src>
import math
import jax
import jax.numpy as jnp
from jax import lax
from jax.experimental import pallas as pl
from jax.experimental.pallas import tpu as pltpu

_INV_SQRT2 = 1.0 / math.sqrt(2.0)


def _gelu_exact(z):
    # torch.nn.GELU() default == exact erf formulation.
    return 0.5 * z * (1.0 + lax.erf(z * _INV_SQRT2))


def _receiver_kernel_fullk(x_ref, w_ref, b_ref, o_ref):
    # One full-K dot per (i, j) output tile: no reduction axis, no accumulator scratch.
    z = lax.dot_general(
        x_ref[...], w_ref[...],
        dimension_numbers=(((1,), (1,)), ((), ())),   # contract the K dim of both
        preferred_element_type=jnp.float32,
    )
    z = z + b_ref[...]                                # (1, tn) broadcasts over rows
    o_ref[...] = _gelu_exact(z).astype(o_ref.dtype)


def _receiver_kernel_ktiled(x_ref, w_ref, b_ref, o_ref, acc_ref):
    k = pl.program_id(2)

    @pl.when(k == 0)
    def _init():
        acc_ref[...] = jnp.zeros_like(acc_ref)

    acc_ref[...] += lax.dot_general(
        x_ref[...], w_ref[...],
        dimension_numbers=(((1,), (1,)), ((), ())),
        preferred_element_type=jnp.float32,
    )

    @pl.when(k == pl.num_programs(2) - 1)
    def _finalize():
        z = acc_ref[...] + b_ref[...]
        o_ref[...] = _gelu_exact(z).astype(o_ref.dtype)


def _round_up(v, m):
    return ((v + m - 1) // m) * m


def _prep(a, target_shape, dtype):
    """Cast and/or zero-pad only when needed (no-op for aligned, correctly-typed inputs)."""
    if a.dtype != dtype:
        a = a.astype(dtype)
    pads = tuple((0, t - s) for s, t in zip(a.shape, target_shape))
    if any(p[1] for p in pads):
        a = jnp.pad(a, pads)
    return a


def receiver_forward(x, weight, bias, *, tm=None, tn=None, tk=None,
                     compute_dtype=jnp.bfloat16):
    """Forward pass of Receiver.

    x:      (B, n_m)
    weight: (n, n_m)   (torch nn.Linear layout: out_features x in_features; NOT transposed)
    bias:   (n,)
    returns (B, n) float32
    """
    B, n_m = x.shape
    n, n_m_w = weight.shape
    assert n_m_w == n_m, (weight.shape, x.shape)

    in_isz = jnp.dtype(compute_dtype).itemsize

    # Lane/sublane-aligned tiles. Large caps (perf review): with bf16 operands the
    # double-buffered footprint at 512/512/1024 is ~9 MiB, f32 ~22 MiB — both fit
    # comfortably even in v7x's 32 MiB scoped / 64 MiB physical VMEM.
    tm = tm if tm is not None else min(512, _round_up(B, 8))
    tn = tn if tn is not None else min(512, _round_up(n, 128))
    tk = tk if tk is not None else min(1024, _round_up(n_m, 128))

    Bp = _round_up(B, tm)
    Np = _round_up(n, tn)
    Kp = _round_up(n_m, tk)
    nbi, nbj, nbk = Bp // tm, Np // tn, Kp // tk

    # Zero padding is exact for matmul + bias; padded rows/cols are sliced off below.
    x_p = _prep(x, (Bp, Kp), compute_dtype)
    w_p = _prep(weight, (Np, Kp), compute_dtype)          # original (out, in) layout
    b_p = _prep(bias.reshape(1, n), (1, Np), jnp.float32)  # added into f32 accumulator

    if nbk == 1:
        # ---- Full-K path: drop the reduction axis entirely. -------------------
        kernel = _receiver_kernel_fullk
        if nbj >= nbi:
            grid = (nbj, nbi)   # j outer -> each W column-block DMA'd exactly once
            x_map = lambda j, i: (i, 0)
            w_map = lambda j, i: (j, 0)
            b_map = lambda j, i: (0, j)
            o_map = lambda j, i: (i, j)
            x_streams, w_streams = nbj, 1
        else:
            grid = (nbi, nbj)   # i outer -> x row-block DMA'd exactly once
            x_map = lambda i, j: (i, 0)
            w_map = lambda i, j: (j, 0)
            b_map = lambda i, j: (0, j)
            o_map = lambda i, j: (i, j)
            x_streams, w_streams = 1, nbi
        in_specs = [
            pl.BlockSpec((tm, Kp), x_map),
            pl.BlockSpec((tn, Kp), w_map),
            pl.BlockSpec((1, tn), b_map),
        ]
        scratch_shapes = []
        dim_sem = ("parallel", "parallel")
        tile_bytes = (2 * (tm * Kp + tn * Kp) * in_isz   # double-buffered inputs
                      + 2 * tm * tn * 4                  # double-buffered output
                      + 2 * tn * 4)                      # bias
    else:
        # ---- k-tiled path with f32 VMEM accumulator (reduction axis last). ----
        kernel = _receiver_kernel_ktiled
        if nbi >= nbj:
            grid = (nbi, nbj, nbk)
            x_map = lambda i, j, k: (i, k)
            w_map = lambda i, j, k: (j, k)
            b_map = lambda i, j, k: (0, j)
            o_map = lambda i, j, k: (i, j)
        else:
            grid = (nbj, nbi, nbk)
            x_map = lambda j, i, k: (i, k)
            w_map = lambda j, i, k: (j, k)
            b_map = lambda j, i, k: (0, j)
            o_map = lambda j, i, k: (i, j)
        x_streams, w_streams = nbj, nbi
        in_specs = [
            pl.BlockSpec((tm, tk), x_map),
            pl.BlockSpec((tn, tk), w_map),
            pl.BlockSpec((1, tn), b_map),
        ]
        scratch_shapes = [pltpu.VMEM((tm, tn), jnp.float32)]
        dim_sem = ("parallel", "parallel", "arbitrary")
        tile_bytes = (2 * (tm * tk + tn * tk) * in_isz
                      + 2 * tm * tn * 4        # double-buffered output
                      + tm * tn * 4            # accumulator scratch
                      + 2 * tn * 4)

    # Sized from the actual footprint; capped so it always leaves headroom under
    # v7x's 64 MiB physical VMEM (fine on v5e/v6e too).
    vmem_limit = int(min(56 * 1024 * 1024,
                         max(32 * 1024 * 1024, tile_bytes + (8 << 20))))

    # Real streamed HBM traffic (operand re-streaming included).
    bytes_accessed = int(Bp * Kp * in_isz * x_streams
                         + Np * Kp * in_isz * w_streams
                         + Np * 4 + Bp * Np * 4)

    out_p = pl.pallas_call(
        kernel,
        out_shape=jax.ShapeDtypeStruct((Bp, Np), jnp.float32),
        grid_spec=pltpu.PrefetchScalarGridSpec(
            num_scalar_prefetch=0,
            grid=grid,
            in_specs=in_specs,
            out_specs=pl.BlockSpec((tm, tn), o_map),
            scratch_shapes=scratch_shapes,
        ),
        compiler_params=pltpu.CompilerParams(
            dimension_semantics=dim_sem,
            vmem_limit_bytes=vmem_limit,
        ),
        cost_estimate=pl.CostEstimate(
            flops=2 * Bp * Kp * Np,
            bytes_accessed=bytes_accessed,
            transcendentals=Bp * Np,
        ),
    )(x_p, w_p, b_p)

    if Bp != B or Np != n:
        out_p = out_p[:B, :n]
    return out_p


def _ref_forward(x, weight, bias):
    z = x @ weight.T + bias
    return _gelu_exact(z)


if __name__ == "__main__":
    key = jax.random.PRNGKey(0)

    def run_case(case_id, B, n_m, n, tiles=None,
                 compute_dtype=jnp.bfloat16, atol=2e-2, rtol=2e-2):
        k_x, k_w, k_b = jax.random.split(jax.random.fold_in(key, case_id), 3)
        x = jax.random.normal(k_x, (B, n_m), dtype=jnp.float32)
        # Mimic nn.Linear's uniform(-1/sqrt(n_m), 1/sqrt(n_m)) init.
        bound = 1.0 / math.sqrt(n_m)
        w = jax.random.uniform(k_w, (n, n_m), minval=-bound, maxval=bound,
                               dtype=jnp.float32)
        b = jax.random.uniform(k_b, (n,), minval=-bound, maxval=bound,
                               dtype=jnp.float32)
        tiles = tiles or {}
        out = jax.block_until_ready(
            receiver_forward(x, w, b, compute_dtype=compute_dtype, **tiles))
        ref = _ref_forward(x, w, b)
        assert out.shape == (B, n)
        assert jnp.allclose(out, ref, atol=atol, rtol=rtol), \
            float(jnp.max(jnp.abs(out - ref)))

    # 1) Tiny shape, exact f32 path, single-block full-K kernel (no k axis).
    run_case(0, B=8, n_m=32, n=64, compute_dtype=jnp.float32, atol=2e-4, rtol=2e-4)
    # 2) Forces the k-tiled accumulator path + multi-block i/j + pad/slice, f32 exact.
    run_case(1, B=16, n_m=256, n=384, tiles=dict(tm=8, tn=128, tk=128),
             compute_dtype=jnp.float32, atol=2e-4, rtol=2e-4)
    # 3) Default bf16 operands (f32 accumulation), unaligned dims, full-K path.
    run_case(2, B=24, n_m=200, n=136)
    # 4) bf16 + k-tiled accumulator path via tk override.
    run_case(3, B=64, n_m=512, n=256, tiles=dict(tk=256))

    print("KERNEL_OK")
</pallas_src>

<mosaic_0001>
module attributes {stable_mosaic.version = 11 : i64} {
  func.func @_receiver_kernel_fullk(%arg0: i32, %arg1: i32, %arg2: memref<8x128xf32, #tpu.memory_space<vmem>>, %arg3: memref<128x128xf32, #tpu.memory_space<vmem>>, %arg4: memref<1x128xf32, #tpu.memory_space<vmem>>, %arg5: memref<8x128xf32, #tpu.memory_space<vmem>>) attributes {dimension_semantics = [#tpu.dimension_semantics<parallel>, #tpu.dimension_semantics<parallel>], iteration_bounds = array<i64: 1, 1>, scalar_prefetch = 0 : i64, scratch_operands = 0 : i64, tpu.core_type = #tpu.core_type<tc>, window_params = [{transform_indices = @transform_0, window_bounds = array<i64: 8, 128>}, {transform_indices = @transform_1, window_bounds = array<i64: 128, 128>}, {transform_indices = @transform_2, window_bounds = array<i64: 1, 128>}, {transform_indices = @transform_3, window_bounds = array<i64: 8, 128>}]} {
    %c0 = arith.constant 0 : index
    %c0_0 = arith.constant 0 : index
    %0 = vector.load %arg2[%c0, %c0_0] : memref<8x128xf32, #tpu.memory_space<vmem>>, vector<8x128xf32>
    %c0_1 = arith.constant 0 : index
    %c0_2 = arith.constant 0 : index
    %1 = vector.load %arg3[%c0_1, %c0_2] : memref<128x128xf32, #tpu.memory_space<vmem>>, vector<128x128xf32>
    %cst = arith.constant dense<0.000000e+00> : vector<8x128xf32>
    %2 = tpu.matmul %0, %1, %cst {dimension_numbers = #tpu.dot_dimension_numbers<[1], [1], [0], [0], [0, 0, 1, 0], [], []>} : vector<8x128xf32>, vector<128x128xf32>, vector<8x128xf32> -> vector<8x128xf32>
    %c0_3 = arith.constant 0 : index
    %c0_4 = arith.constant 0 : index
    %3 = vector.load %arg4[%c0_3, %c0_4] : memref<1x128xf32, #tpu.memory_space<vmem>>, vector<1x128xf32>
    %4 = vector.broadcast %3 : vector<1x128xf32> to vector<8x128xf32>
    %5 = arith.addf %2, %4 : vector<8x128xf32>
    %cst_5 = arith.constant 5.000000e-01 : f32
    %6 = vector.broadcast %cst_5 : f32 to vector<8x128xf32>
    %7 = arith.mulf %6, %5 : vector<8x128xf32>
    %cst_6 = arith.constant 0.707106769 : f32
    %8 = vector.broadcast %cst_6 : f32 to vector<8x128xf32>
    %9 = arith.mulf %5, %8 : vector<8x128xf32>
    %10 = math.erf %9 : vector<8x128xf32>
    %cst_7 = arith.constant 1.000000e+00 : f32
    %11 = vector.broadcast %cst_7 : f32 to vector<8x128xf32>
    %12 = arith.addf %11, %10 : vector<8x128xf32>
    %13 = arith.mulf %7, %12 : vector<8x128xf32>
    %c0_8 = arith.constant 0 : index
    %c0_9 = arith.constant 0 : index
    %14 = vector.load %arg5[%c0_8, %c0_9] : memref<8x128xf32, #tpu.memory_space<vmem>>, vector<8x128xf32>
    tpu.vector_store %arg5[%c0_8, %c0_9], %13 {strides = array<i32>} : memref<8x128xf32, #tpu.memory_space<vmem>>, vector<8x128xf32>,
    return
  }
  func.func @transform_0(%arg0: i32, %arg1: i32) -> (i32, i32) {
    %c0_i32 = arith.constant 0 : i32
    %c0_i32_0 = arith.constant 0 : i32
    return %arg1, %c0_i32 : i32, i32
  }
  func.func @transform_1(%arg0: i32, %arg1: i32) -> (i32, i32) {
    %c0_i32 = arith.constant 0 : i32
    %c0_i32_0 = arith.constant 0 : i32
    return %arg0, %c0_i32 : i32, i32
  }
  func.func @transform_2(%arg0: i32, %arg1: i32) -> (i32, i32) {
    %c0_i32 = arith.constant 0 : i32
    %c0_i32_0 = arith.constant 0 : i32
    return %c0_i32, %arg0 : i32, i32
  }
  func.func @transform_3(%arg0: i32, %arg1: i32) -> (i32, i32) {
    %c0_i32 = arith.constant 0 : i32
    return %arg1, %arg0 : i32, i32
  }
}

</mosaic_0001>

<bundles_post_ra>
// kernel: tpu_custom_call.1
= control target key start
LH: loop header
LB: loop body
LE: loop exit
PB: predicated region body
PF: predicated region fallthrough
CT: control target
= control target key end

     0   :  { %8 = vsyncpa [#allocation3], 0  ;;  %s273_s0 = inlined_call_operand.hbm [shape: f32[8,128], index: 0, kind: input, shape index: {}]   ;;  %s274_s1 = inlined_call_operand.hbm [shape: f32[128,128], index: 1, kind: input, shape index: {}]   ;;  %s275_s2 = inlined_call_operand.vmem [shape: f32[1,128], index: 2, kind: input, shape index: {}]   ;;  %s276_s3 = inlined_call_operand.hbm [shape: f32[8,128], index: 3, kind: output, shape index: {}]  }
   0x1   :  { %9 = vsyncpa [#allocation6], 0 }
   0x2   :  { %10 = vsyncpa [#allocation4], 0  ;;  %s16_s14 = sshll.u32 %s273_s0, 4  ;;  %s236_s15 = smov [#allocation2]   ;;  %s17_s14 = int_to_ptr.hbm [resolvable:$true] %s16_s14 }
   0x3   :  { %s18_s16 = sshll.u32 %s236_s15, 4  ;;  %s26_s19 = sshll.u32 %s274_s1, 4  ;;  %s19_s16 = int_to_ptr.vmem [resolvable:$true] %s18_s16  ;;  %s27_s19 = int_to_ptr.hbm [resolvable:$true] %s26_s19 }
   0x4   :  { %21 = dma.hbm_to_vmem [thread:$0]  %s17_s14, 128, %s19_s16, [#allocation3]  }
   0x5   :  { %s237_s20 = smov [#allocation5]   ;;  %s238_s22 = smov 128  }
   0x6   :  { %s28_s21 = sshll.u32 %s237_s20, 4  ;;  %s239_s23 = smov 8   ;;  %s29_s21 = int_to_ptr.vmem [resolvable:$true] %s28_s21 }
   0x7   :  { %34 = dma.hbm_to_vmem [thread:$0]  %s27_s19, 2048, %s29_s21, [#allocation6], %s238_s22, %s238_s22, %s239_s23  }
   0x8   :  { %230 = dma.done.wait [#allocation3], 128  }
   0x9   :  { %231 = vsyncadd [#allocation3], 4294967168 }
   0xa   :  { %232 = dma.done.wait [#allocation6], 2048  }
   0xb   :  { %233 = vsyncadd [#allocation6], 4294965248  ;;  %v61_v0 = vld [vmem:[#allocation5 + $0x78] sm:$0xff]  ;;  %v60_v1 = vld [vmem:[#allocation5 + $0x70] sm:$0xff]  ;;  %s138_s27 = sshll.u32 %s276_s3, 4  ;;  %s139_s27 = int_to_ptr.hbm [resolvable:$true] %s138_s27 }
   0xc   :  { %66 = vmatpush.xpose.msra.mxu0 %v61_v0  ;;  %v59_v2 = vld [vmem:[#allocation5 + $0x68] sm:$0xff]  ;;  %v58_v3 = vld [vmem:[#allocation5 + $0x60] sm:$0xff]  ;;  %v57_v4 = vld [vmem:[#allocation5 + $0x58] sm:$0xff] }
   0xd   :  { %v56_v5 = vld [vmem:[#allocation5 + $0x50] sm:$0xff]  ;;  %v55_v6 = vld [vmem:[#allocation5 + $0x48] sm:$0xff]  ;;  %v54_v7 = vld [vmem:[#allocation5 + $0x40] sm:$0xff] }
   0xe   :  { %v53_v8 = vld [vmem:[#allocation5 + $0x38] sm:$0xff]  ;;  %v52_v9 = vld [vmem:[#allocation5 + $0x30] sm:$0xff]  ;;  %v51_v10 = vld [vmem:[#allocation5 + $0x28] sm:$0xff] }
   0xf   :  { %v50_v11 = vld [vmem:[#allocation5 + $0x20] sm:$0xff]  ;;  %v49_v12 = vld [vmem:[#allocation5 + $0x18] sm:$0xff]  ;;  %v48_v13 = vld [vmem:[#allocation5 + $0x10] sm:$0xff] }
  0x10   :  { %67 = vmatpush.xpose.msra.mxu0 %v60_v1  ;;  %v47_v14 = vld [vmem:[#allocation5 + $0x8] sm:$0xff]  ;;  %v46_v15 = vld [vmem:[#allocation5] sm:$0xff]  ;;  %v45_v16 = vld [vmem:[#allocation2] sm:$0xff] }
  0x11   :  { %v155_v17 = vld [vmem:[%s275_s2] ss:$0 sm:$0xff]  ;;  %s240_s2 = smov [#allocation7]  }
  0x12   :  { %s136_s24 = sshll.u32 %s240_s2, 4  ;;  %s137_s24 = int_to_ptr.vmem [resolvable:$true] %s136_s24 }
  0x14   :  { %68 = vmatpush.xpose.msra.mxu0 %v59_v2 }
  0x18   :  { %69 = vmatpush.xpose.msra.mxu0 %v58_v3 }
  0x1c   :  { %70 = vmatpush.xpose.msra.mxu0 %v57_v4 }
  0x20   :  { %71 = vmatpush.xpose.msra.mxu0 %v56_v5 }
  0x24   :  { %72 = vmatpush.xpose.msra.mxu0 %v55_v6 }
  0x28   :  { %73 = vmatpush.xpose.msra.mxu0 %v54_v7 }
  0x2c   :  { %74 = vmatpush.xpose.msra.mxu0 %v53_v8 }
  0x30   :  { %75 = vmatpush.xpose.msra.mxu0 %v52_v9 }
  0x34   :  { %76 = vmatpush.xpose.msra.mxu0 %v51_v10 }
  0x38   :  { %77 = vmatpush.xpose.msra.mxu0 %v50_v11 }
  0x3c   :  { %78 = vmatpush.xpose.msra.mxu0 %v49_v12 }
  0x40   :  { %79 = vmatpush.xpose.msra.mxu0 %v48_v13 }
  0x44   :  { %80 = vmatpush.xpose.msra.mxu0 %v47_v14 }
  0x48   :  { %81 = vmatpush.xpose.msra.mxu0 %v46_v15 }
  0x4b   :  { %82 = vmatmul.f32.vlgmr.msra.gmra.mxu0 %v45_v16 }
  0xc8   :  { %v83_v18 = vpop.f32.mrf.mxu0 }
  0xc9   :  { %v84_v19 = vadd.f32 %v155_v17, %v83_v18 }
  0xcb   :  { %v87_v20 = vmul.f32 0.70710677, %v84_v19  ;;  %v86_v56 = vmul.f32 0.5, %v84_v19 }
  0xcd   :  { %v88_v21 = vmul.f32 %v87_v20, %v87_v20 }
  0xcf   :  { %v89_v22 = vmin.f32 %v88_v21, 16.0 }
  0xd1   :  { %v90_v23 = vmul.f32 2.1237322e-06, %v89_v22  ;;  %v101_v24 = vmul.f32 3.8918573e-05, %v89_v22 }
  0xd3   :  { %v91_v25 = vadd.f32 0.00028619796, %v90_v23  ;;  %v102_v26 = vadd.f32 0.001143296, %v101_v24 }
  0xd5   :  { %v92_v27 = vmul.f32 %v91_v25, %v89_v22  ;;  %v103_v28 = vmul.f32 %v102_v26, %v89_v22 }
  0xd7   :  { %v104_v29 = vadd.f32 0.014752088, %v103_v28  ;;  %v93_v30 = vadd.f32 0.0036580483, %v92_v27 }
  0xd9   :  { %v105_v31 = vmul.f32 %v104_v29, %v89_v22  ;;  %v94_v33 = vmul.f32 %v93_v30, %v89_v22 }
  0xdb   :  { %v106_v32 = vadd.f32 0.112945676, %v105_v31  ;;  %v95_v36 = vadd.f32 0.05243302, %v94_v33 }
  0xdd   :  { %v107_v34 = vmul.f32 %v106_v32, %v89_v22  ;;  %v96_v39 = vmul.f32 %v95_v36, %v89_v22 }
  0xdf   :  { %v108_v35 = vadd.f32 0.4994258, %v107_v34  ;;  %v97_v40 = vadd.f32 0.18741608, %v96_v39 }
  0xe1   :  { %v109_v37 = vmul.f32 %v108_v35, %v89_v22  ;;  %v98_v42 = vmul.f32 %v97_v40, %v89_v22 }
  0xe3   :  { %v110_v38 = vadd.f32 1.0, %v109_v37  ;;  %v99_v46 = vadd.f32 1.1283791, %v98_v42 }
  0xe5   :  { %156 = vrcp.f32 %v110_v38  ;;  %v122_v45 = vand.u32 2147483648, %v110_v38  ;;  %v120_v48 = vand.u32 2147483647, %v110_v38  ;;  %vm116_vm1 = vweird.f32 %v110_v38 }
  0xe6   :  { %v100_v51 = vmul.f32 %v99_v46, %v87_v20 }
  0xe7   :  { %v123_v50 = vor.u32 1.1754944e-38, %v122_v45  ;;  %vm121_vm3 = vcmp.eq.f32.partialorder %v120_v48, 8.507059e+37 }
  0xeb   :  { %v157_v41 = vpop.eup %156 }
  0xec   :  { %v112_v43 = vmul.f32 %v157_v41, %v110_v38  ;;  %vm117_vm0 = vweird.f32 %v157_v41 }
  0xed   :  { %vm118_vm2 = vmor %vm116_vm1, %vm117_vm0 }
  0xee   :  { %v113_v44 = vsub.f32 1.0, %v112_v43 }
  0xf0   :  { %v114_v47 = vmul.f32 %v157_v41, %v113_v44 }
  0xf2   :  { %v115_v49 = vadd.f32 %v157_v41, %v114_v47 }
  0xf4   :  { %v119_v52 = vsel %vm118_vm2, %v157_v41, %v115_v49 }
  0xf5   :  { %v124_v53 = vsel %vm121_vm3, %v123_v50, %v119_v52 }
  0xf6   :  { %v125_v54 = vmul.f32 %v124_v53, %v100_v51 }
  0xf8   :  { %v149_v55 = vclamps-f32 %v125_v54, 1.0 }
  0xfa   :  { %v128_v57 = vadd.f32 1.0, %v149_v55 }
  0xfc   :  { %v129_v58 = vmul.f32 %v128_v57, %v86_v56 }
  0xfe   :  { %130 = vst [vmem:[#allocation7] sm:$0xff] %v129_v58 }
  0xff   :  { %141 = dma.vmem_to_hbm [thread:$0]  %s137_s24, 128, %s139_s27, [#allocation4]  }
 0x100   :  { %234 = dma.done.wait [#allocation4], 128  }
 0x101   :  { %235 = vsyncadd [#allocation4], 4294967168 }
 0x102   :  { %146 = vsyncpa [#allocation3], 1 }
 0x103   :  { %147 = vsyncpa [#allocation6], 1 }
 0x104   :  { %148 = vsyncpa [#allocation4], 1 }

</bundles_post_ra>
